<compile_context>
chip_gen: v5e
topology: v5e:2x2
jax: 0.10.0
libtpu: 0.0.40
codegen_flags: <defaults>
</compile_context>

<pallas_src>
import functools

import jax
import jax.numpy as jnp
from jax import lax
from jax.experimental import pallas as pl
from jax.experimental.pallas import tpu as pltpu


T = 6
N_CHANNELS = 64
IMG_CHANNELS = 1

_PAR1 = pltpu.CompilerParams(dimension_semantics=("parallel",))


def _round_up(x, m):
    return ((x + m - 1) // m) * m


def _apply_act(x, act):
    if act == "relu":
        return jnp.maximum(x, 0.0)
    if act == "sigmoid":
        return 1.0 / (1.0 + jnp.exp(-x))
    return x


# --------------------------------------------------------------------------
# Kernel bodies
# --------------------------------------------------------------------------
def _matmul_kernel(a_ref, w_ref, b_ref, o_ref, *, act):
    acc = jnp.dot(a_ref[...], w_ref[...], preferred_element_type=jnp.float32)
    acc = _apply_act(acc + b_ref[...], act)
    o_ref[...] = acc.astype(o_ref.dtype)


def _matmul_res_kernel(a_ref, w_ref, b_ref, r_ref, o_ref, *, act):
    acc = jnp.dot(a_ref[...], w_ref[...], preferred_element_type=jnp.float32)
    acc = _apply_act(acc + b_ref[...], act)
    acc = acc + r_ref[...].astype(jnp.float32)
    o_ref[...] = acc.astype(o_ref.dtype)


def _recon_kernel(r_ref, f_ref, n_ref, o_ref, *, de, la, ga):
    r = r_ref[...].astype(jnp.float32)
    f = f_ref[...].astype(jnp.float32)
    n = n_ref[...].astype(jnp.float32)
    r2 = r * r
    f2 = f * f
    n2 = n * n
    inv_den = pl.reciprocal(r2 * r2 + 0.001, approx=True)
    rec = r2 - de * (la * (r2 - n2) * inv_den + ga * (r2 - f2))
    # Faithful to PyTorch: no clamping, sqrt of a negative value gives NaN.
    o_ref[...] = jnp.sqrt(rec).astype(o_ref.dtype)


def _ca_fused_kernel(body_ref, res_ref, w1_ref, b1_ref, w2_ref, b2_ref, o_ref):
    # CALayer tail for one batch element:
    #   gate = sigmoid(W2 @ relu(W1 @ mean(body) + b1) + b2)
    #   out  = body * gate + residual
    body = body_ref[...].astype(jnp.float32)                 # (1, HW, C)
    hw = body.shape[1]
    mean = jnp.sum(body, axis=1) * (1.0 / hw)                # (1, C)
    mean8 = jnp.broadcast_to(mean, (8, mean.shape[1]))       # sublane-aligned
    z1 = jnp.dot(mean8, w1_ref[...],
                 preferred_element_type=jnp.float32) + b1_ref[...]
    z1 = jnp.maximum(z1, 0.0)
    z2 = jnp.dot(z1, w2_ref[...],
                 preferred_element_type=jnp.float32) + b2_ref[...]
    gate = 1.0 / (1.0 + jnp.exp(-z2))                        # (8, C) equal rows
    out = body * gate[0:1, :][None] + res_ref[...].astype(jnp.float32)
    o_ref[...] = out.astype(o_ref.dtype)


# --------------------------------------------------------------------------
# Jitted pallas_call wrappers (compile-once per shape signature)
# --------------------------------------------------------------------------
@functools.partial(jax.jit, static_argnames=("act", "block_m"))
def _pallas_matmul(a, w, b2d, *, act, block_m):
    mp, kp = a.shape
    cp = w.shape[1]
    return pl.pallas_call(
        functools.partial(_matmul_kernel, act=act),
        out_shape=jax.ShapeDtypeStruct((mp, cp), a.dtype),
        grid=(mp // block_m,),
        in_specs=[pl.BlockSpec((block_m, kp), lambda i: (i, 0)),
                  pl.BlockSpec((kp, cp), lambda i: (0, 0)),
                  pl.BlockSpec((1, cp), lambda i: (0, 0))],
        out_specs=pl.BlockSpec((block_m, cp), lambda i: (i, 0)),
        compiler_params=_PAR1,
    )(a, w, b2d)


@functools.partial(jax.jit, static_argnames=("act", "block_m"))
def _pallas_matmul_res(a, w, b2d, res, *, act, block_m):
    mp, kp = a.shape
    cp = w.shape[1]
    return pl.pallas_call(
        functools.partial(_matmul_res_kernel, act=act),
        out_shape=jax.ShapeDtypeStruct((mp, cp), a.dtype),
        grid=(mp // block_m,),
        in_specs=[pl.BlockSpec((block_m, kp), lambda i: (i, 0)),
                  pl.BlockSpec((kp, cp), lambda i: (0, 0)),
                  pl.BlockSpec((1, cp), lambda i: (0, 0)),
                  pl.BlockSpec((block_m, cp), lambda i: (i, 0))],
        out_specs=pl.BlockSpec((block_m, cp), lambda i: (i, 0)),
        compiler_params=_PAR1,
    )(a, w, b2d, res)


@functools.partial(jax.jit, static_argnames=("de", "la", "ga", "block_r"))
def _pallas_recon_2d(r, f, n, *, de, la, ga, block_r):
    rows, lanes = r.shape
    spec = pl.BlockSpec((block_r, lanes), lambda i: (i, 0))
    return pl.pallas_call(
        functools.partial(_recon_kernel, de=de, la=la, ga=ga),
        out_shape=jax.ShapeDtypeStruct((rows, lanes), r.dtype),
        grid=(rows // block_r,),
        in_specs=[spec, spec, spec],
        out_specs=spec,
        compiler_params=_PAR1,
    )(r, f, n)


@jax.jit
def _pallas_ca_fused(body3, res3, w1, b1, w2, b2):
    n, hw, c = body3.shape
    big = pl.BlockSpec((1, hw, c), lambda i: (i, 0, 0))
    wspec = pl.BlockSpec((c, c), lambda i: (0, 0))
    bspec = pl.BlockSpec((1, c), lambda i: (0, 0))
    return pl.pallas_call(
        _ca_fused_kernel,
        out_shape=jax.ShapeDtypeStruct((n, hw, c), body3.dtype),
        grid=(n,),
        in_specs=[big, big, wspec, bspec, wspec, bspec],
        out_specs=big,
        compiler_params=_PAR1,
    )(body3, res3, w1, b1, w2, b2)


# --------------------------------------------------------------------------
# Op wrappers (Pallas vs pure-JAX reference path share all layout plumbing)
# --------------------------------------------------------------------------
def _ew_tiling(total):
    """Lane-dense 2D tiling for flattened elementwise ops (<= ~0.5 MiB/array)."""
    lanes = 512 if total >= 4096 else 128
    rows = -(-total // lanes)
    if rows >= 256:
        rows_p, block_r = _round_up(rows, 256), 256
    else:
        rows_p = _round_up(rows, 8)
        block_r = rows_p
    return lanes, rows_p, block_r


def _flatten_pad(a, rows_p, lanes, fill):
    total = a.size
    flat = a.reshape(-1)
    pad = rows_p * lanes - total
    if pad:
        flat = jnp.concatenate([flat, jnp.full((pad,), fill, a.dtype)])
    return flat.reshape(rows_p, lanes)


@functools.partial(jax.jit, static_argnames=("de", "la", "ga", "use_pallas"))
def recon_op(y, feature, noise, de=0.001, la=0.55, ga=1.0, use_pallas=True):
    """Recon module: sqrt(y^2 - de*(la*(y^2-n^2)/(y^4+1e-3) + ga*(y^2-f^2)))."""
    if not use_pallas:
        r2, f2, n2 = y * y, feature * feature, noise * noise
        rec = r2 - de * (la * (r2 - n2) / (r2 * r2 + 0.001) + ga * (r2 - f2))
        return jnp.sqrt(rec)
    shape = y.shape
    total = y.size
    lanes, rows_p, block_r = _ew_tiling(total)
    out = _pallas_recon_2d(_flatten_pad(y, rows_p, lanes, 1.0),
                           _flatten_pad(feature, rows_p, lanes, 1.0),
                           _flatten_pad(noise, rows_p, lanes, 1.0),
                           de=float(de), la=float(la), ga=float(ga),
                           block_r=block_r)
    return out.reshape(-1)[:total].reshape(shape)


def matmul_bias_act(a, w, bias, act, use_pallas, residual=None):
    """out = act(a @ w + bias) (+ residual);  a:(M,K) w:(K,Cout) bias:(Cout,)."""
    m, k = a.shape
    cout = w.shape[1]
    if not use_pallas:
        out = jnp.dot(a, w, precision=lax.Precision.HIGHEST) + bias[None, :]
        out = _apply_act(out, act)
        if residual is not None:
            out = out + residual
        return out
    mp = _round_up(m, 256) if m >= 256 else _round_up(m, 8)
    block_m = 256 if (mp % 256 == 0 and mp >= 256) else mp
    kp = _round_up(k, 128)      # 128-aligned contraction dim
    cp = _round_up(cout, 128)   # lane-dense (unmasked) output stores
    a_p = jnp.pad(a, ((0, mp - m), (0, kp - k)))
    w_p = jnp.pad(w, ((0, kp - k), (0, cp - cout)))
    b_p = jnp.pad(bias, (0, cp - cout)).reshape(1, cp)
    if residual is None:
        out = _pallas_matmul(a_p, w_p, b_p, act=act, block_m=block_m)
    else:
        r_p = jnp.pad(residual, ((0, mp - m), (0, cp - cout)))
        out = _pallas_matmul_res(a_p, w_p, b_p, r_p, act=act, block_m=block_m)
    return out[:m, :cout]


def ca_layer_tail(body_flat, res_flat, w1, b1, w2, b2, n, hw, c, use_pallas):
    """CALayer tail: global mean -> conv_du(relu,sigmoid) -> gate -> +residual."""
    body3 = body_flat.reshape(n, hw, c)
    res3 = res_flat.reshape(n, hw, c)
    if use_pallas:
        out3 = _pallas_ca_fused(body3, res3, w1, b1.reshape(1, c),
                                w2, b2.reshape(1, c))
    else:
        mean = jnp.mean(body3, axis=1, keepdims=True)                # (n,1,c)
        z1 = jnp.maximum(
            jnp.einsum("nic,cd->nid", mean, w1,
                       precision=lax.Precision.HIGHEST) + b1, 0.0)
        z2 = jnp.einsum("nic,cd->nid", z1, w2,
                        precision=lax.Precision.HIGHEST) + b2
        gate = 1.0 / (1.0 + jnp.exp(-z2))
        out3 = body3 * gate + res3
    return out3.reshape(n * hw, c)


# TODO(synk): 3x3 halo/patch extraction is wrapper-side XLA layout plumbing
# (im2col) feeding the Pallas matmul kernel; an in-kernel halo DMA would avoid
# the 9x patch expansion but is unnecessary at these sizes.
def _im2col_3x3(x_nhwc, dilation):
    n, h, w, c = x_nhwc.shape
    d = dilation
    xp = jnp.pad(x_nhwc, ((0, 0), (d, d), (d, d), (0, 0)))
    taps = [xp[:, dy * d:dy * d + h, dx * d:dx * d + w, :]
            for dy in range(3) for dx in range(3)]
    patches = jnp.stack(taps, axis=3)            # (N, H, W, 9, C)
    return patches.reshape(n * h * w, 9 * c)


# --------------------------------------------------------------------------
# Model (multi_drn + Recon loop)
# --------------------------------------------------------------------------
def make_params(key, c=N_CHANNELS, ci=IMG_CHANNELS, w3=0.03, w1=0.05):
    # TODO(synk): PyTorch's nn.init.orthogonal_ is not reproduced; weights are
    # deterministic scaled-normal placeholders, biases zero (as in the spec).
    ks = jax.random.split(key, 11)

    def wz(k, shape, s):
        return s * jax.random.normal(k, shape, jnp.float32)

    def z(n):
        return jnp.zeros((n,), jnp.float32)

    p = {"net1": (wz(ks[0], (9 * ci, c), w3), z(c))}
    for i, name in enumerate(["net2", "net3", "net4", "ca_body1",
                              "ca_body2", "net5", "net6"]):
        p[name] = (wz(ks[1 + i], (9 * c, c), w3), z(c))
    p["net7"] = (wz(ks[8], (9 * c, ci), w3), z(ci))
    p["denoise_1x1"] = (wz(ks[9], (c, c), w1), z(c))
    kdu1, kdu2 = jax.random.split(ks[10])
    p["ca_du1"] = (wz(kdu1, (c, c), w1), z(c))
    p["ca_du2"] = (wz(kdu2, (c, c), w1), z(c))
    return p


@functools.partial(jax.jit, static_argnames=("use_pallas",))
def multi_drn_forward(x_nchw, params, use_pallas=True):
    n, ci, h, w = x_nchw.shape
    m = n * h * w
    c = N_CHANNELS
    x_flat = jnp.transpose(x_nchw, (0, 2, 3, 1)).reshape(m, ci)

    def conv3x3(inp_flat, cin, name, dil, act, residual=None):
        patches = _im2col_3x3(inp_flat.reshape(n, h, w, cin), dil)
        wt, b = params[name]
        return matmul_bias_act(patches, wt, b, act, use_pallas, residual=residual)

    out1 = conv3x3(x_flat, ci, "net1", 1, "relu")
    out2 = conv3x3(out1, c, "net2", 2, "relu")
    # residual add (out3 + out1) fused into net3's matmul epilogue
    out3p = conv3x3(out2, c, "net3", 3, "relu", residual=out1)
    out4 = conv3x3(out3p, c, "net4", 1, "relu")

    # denoise block: AvgPool2d(3,1,1) then 1x1 conv is linear -> compose both
    # into a single 3x3-equivalent matmul (W_eff = tile(W_1x1/9, (9,1))),
    # with the residual add fused into the epilogue.
    w_d, b_d = params["denoise_1x1"]
    w_eff = jnp.tile(w_d * (1.0 / 9.0), (9, 1))              # (9C, C)
    patches4 = _im2col_3x3(out4.reshape(n, h, w, c), 1)
    dn = matmul_bias_act(patches4, w_eff, b_d, None, use_pallas, residual=out4)

    # CALayer: body convs via matmul kernels; pool + conv_du + gate + residual
    # fused into one per-batch Pallas kernel.
    ca1 = conv3x3(dn, c, "ca_body1", 1, "relu")
    ca_body = conv3x3(ca1, c, "ca_body2", 1, None)
    w1, b1 = params["ca_du1"]
    w2, b2 = params["ca_du2"]
    ca_out = ca_layer_tail(ca_body, dn, w1, b1, w2, b2, n, h * w, c, use_pallas)

    out5 = conv3x3(ca_out, c, "net5", 3, "relu")
    # residual add (out6 + ca_out) fused into net6's matmul epilogue
    out6p = conv3x3(out5, c, "net6", 2, "relu", residual=ca_out)
    out = conv3x3(out6p, c, "net7", 1, None, residual=x_flat)  # (M, 1)
    return jnp.transpose(out.reshape(n, h, w, ci), (0, 3, 1, 2))


def sar_rdcp_forward(x, params, use_pallas=True, t=T, de=0.001, la=0.55, ga=1.0):
    y = x
    out = multi_drn_forward(y, params, use_pallas=use_pallas)
    for _ in range(t - 1):
        y = recon_op(y, out, x, de=de, la=la, ga=ga, use_pallas=use_pallas)
        out = multi_drn_forward(y, params, use_pallas=use_pallas)
    return out


# --------------------------------------------------------------------------
if __name__ == "__main__":
    key = jax.random.PRNGKey(0)
    k_in, k_par = jax.random.split(key)

    n, ci, h, w = 2, IMG_CHANNELS, 16, 16
    x = jax.random.uniform(k_in, (n, ci, h, w), jnp.float32,
                           minval=0.5, maxval=2.0)
    params = make_params(k_par)

    # Pallas forward pass
    out = sar_rdcp_forward(x, params, use_pallas=True)
    out = jax.block_until_ready(out)
    assert out.shape == (n, ci, h, w)
    assert bool(jnp.all(jnp.isfinite(out)))

    # Pure-JAX reference (same math, same weights)
    ref = sar_rdcp_forward(x, params, use_pallas=False)
    ref = jax.block_until_ready(ref)
    assert jnp.allclose(out, ref, atol=1e-2, rtol=1e-2), "full-model mismatch"

    # Standalone check of the Recon kernel
    k1, k2, k3 = jax.random.split(k_in, 3)
    ry = jax.random.uniform(k1, (2, 4, 16, 16), jnp.float32, minval=0.5, maxval=2.0)
    rf = jax.random.uniform(k2, (2, 4, 16, 16), jnp.float32, minval=0.5, maxval=2.0)
    rn = jax.random.uniform(k3, (2, 4, 16, 16), jnp.float32, minval=0.0, maxval=0.5)
    ro = recon_op(ry, rf, rn, de=0.001, la=0.55, ga=1.0, use_pallas=True)
    rr = recon_op(ry, rf, rn, de=0.001, la=0.55, ga=1.0, use_pallas=False)
    ro = jax.block_until_ready(ro)
    assert ro.shape == ry.shape
    assert jnp.allclose(ro, rr, atol=1e-3, rtol=1e-3), "recon kernel mismatch"

    print("KERNEL_OK")
</pallas_src>

<mosaic_0001>
module attributes {stable_mosaic.version = 11 : i64} {
  func.func @_matmul_kernel(%arg0: i32, %arg1: memref<256x128xf32, #tpu.memory_space<vmem>>, %arg2: memref<128x128xf32, #tpu.memory_space<vmem>>, %arg3: memref<1x128xf32, #tpu.memory_space<vmem>>, %arg4: memref<256x128xf32, #tpu.memory_space<vmem>>) attributes {dimension_semantics = [#tpu.dimension_semantics<parallel>], iteration_bounds = array<i64: 2>, scalar_prefetch = 0 : i64, scratch_operands = 0 : i64, tpu.core_type = #tpu.core_type<tc>, window_params = [{transform_indices = @transform_0, window_bounds = array<i64: 256, 128>}, {pipeline_mode = #tpu.pipeline_mode<synchronous>, transform_indices = @transform_1, window_bounds = array<i64: 128, 128>}, {pipeline_mode = #tpu.pipeline_mode<synchronous>, transform_indices = @transform_2, window_bounds = array<i64: 1, 128>}, {transform_indices = @transform_3, window_bounds = array<i64: 256, 128>}]} {
    %c0 = arith.constant 0 : index
    %c0_0 = arith.constant 0 : index
    %0 = vector.load %arg1[%c0, %c0_0] : memref<256x128xf32, #tpu.memory_space<vmem>>, vector<256x128xf32>
    %c0_1 = arith.constant 0 : index
    %c0_2 = arith.constant 0 : index
    %1 = vector.load %arg2[%c0_1, %c0_2] : memref<128x128xf32, #tpu.memory_space<vmem>>, vector<128x128xf32>
    %cst = arith.constant dense<0.000000e+00> : vector<256x128xf32>
    %2 = tpu.matmul %0, %1, %cst {dimension_numbers = #tpu.dot_dimension_numbers<[1], [0], [0], [1], [0, 0, 1, 1], [], []>} : vector<256x128xf32>, vector<128x128xf32>, vector<256x128xf32> -> vector<256x128xf32>
    %c0_3 = arith.constant 0 : index
    %c0_4 = arith.constant 0 : index
    %3 = vector.load %arg3[%c0_3, %c0_4] : memref<1x128xf32, #tpu.memory_space<vmem>>, vector<1x128xf32>
    %4 = vector.broadcast %3 : vector<1x128xf32> to vector<256x128xf32>
    %5 = arith.addf %2, %4 : vector<256x128xf32>
    %cst_5 = arith.constant 0.000000e+00 : f32
    %6 = vector.broadcast %cst_5 : f32 to vector<256x128xf32>
    %7 = arith.maximumf %5, %6 : vector<256x128xf32>
    %c0_6 = arith.constant 0 : index
    %c0_7 = arith.constant 0 : index
    %8 = vector.load %arg4[%c0_6, %c0_7] : memref<256x128xf32, #tpu.memory_space<vmem>>, vector<256x128xf32>
    tpu.vector_store %arg4[%c0_6, %c0_7], %7 {strides = array<i32>} : memref<256x128xf32, #tpu.memory_space<vmem>>, vector<256x128xf32>,
    return
  }
  func.func @transform_0(%arg0: i32) -> (i32, i32) {
    %c0_i32 = arith.constant 0 : i32
    %c0_i32_0 = arith.constant 0 : i32
    return %arg0, %c0_i32 : i32, i32
  }
  func.func @transform_1(%arg0: i32) -> (i32, i32) {
    %c0_i32 = arith.constant 0 : i32
    %c0_i32_0 = arith.constant 0 : i32
    %c0_i32_1 = arith.constant 0 : i32
    return %c0_i32, %c0_i32_0 : i32, i32
  }
  func.func @transform_2(%arg0: i32) -> (i32, i32) {
    %c0_i32 = arith.constant 0 : i32
    %c0_i32_0 = arith.constant 0 : i32
    %c0_i32_1 = arith.constant 0 : i32
    return %c0_i32, %c0_i32_0 : i32, i32
  }
  func.func @transform_3(%arg0: i32) -> (i32, i32) {
    %c0_i32 = arith.constant 0 : i32
    %c0_i32_0 = arith.constant 0 : i32
    return %arg0, %c0_i32 : i32, i32
  }
}

</mosaic_0001>

<bundles_post_ra>
// kernel: _pallas_matmul.1
= control target key start
LH: loop header
LB: loop body
LE: loop exit
PB: predicated region body
PF: predicated region fallthrough
CT: control target
= control target key end

     0   :  { %8 = vsyncpa [#allocation3], 0  ;;  %s1077_s0 = inlined_call_operand.hbm [shape: f32[512,128], index: 0, kind: input, shape index: {}]   ;;  %s1078_s1 = inlined_call_operand.hbm [shape: f32[128,128], index: 1, kind: input, shape index: {}]   ;;  %s1079_s2 = inlined_call_operand.vmem [shape: f32[1,128], index: 2, kind: input, shape index: {}]   ;;  %s1080_s3 = inlined_call_operand.hbm [shape: f32[512,128], index: 3, kind: output, shape index: {}]  }
   0x1   :  { %10 = vsyncpa [#allocation3 + $0x1], 0 }
   0x2   :  { %11 = vsyncpa [#allocation6], 0 }
   0x3   :  { %12 = vsyncpa [#allocation4], 0 }
   0x4   :  { %14 = vsyncpa [#allocation4 + $0x1], 0  ;;  %s823_s12 = smov 0   ;;  %s825_s13 = smov 0  }
   0x5   :  { %s827_s14 = smov 0   ;;  %s829_s15 = smov 0  }
   0x6 LB: > { %s844_s16 = sadd.s32 4294967295, %s796_s15   ;;  %s538_s17 = sadd.s32 4294967294, %s796_s15   ;;  %s796_s15 = sphi %s829_s15, %s1090_s15   ;;  %s792_s14 = sphi %s827_s14, %s1089_s14   ;;  %s788_s13 = sphi %s825_s13, %s1088_s13   ;;  %s784_s12 = sphi %s823_s12, %s1087_s12  }
   0x7   : > { %p40_p0 = scmp.ne.s32.totalorder %s788_s13, %s784_s12  ;;  %p41_p1 = scmp.eq.s32.totalorder %s844_s16, 0 }
   0x8   : > { %p106_p2 = scmp.eq.s32.totalorder %s844_s16, 1  ;;  %p112_p3 = scmp.eq.s32.totalorder %s538_s17, 1 }
   0x9   : > { %p853_p4 = por %p41_p1, %p40_p0  ;;  %p539_p5 = scmp.ge.s32.totalorder %s796_s15, 1 }
   0xa   : > { %p858_p6 = por %p112_p3, %p40_p0  ;;  %p119_p7 = scmp.lt.s32.totalorder %s796_s15, 3 }
   0xb   : > { %s130_s22 = sshll.u32 %s1078_s1, 4  ;;  %s798_s24 = smov [#allocation5]   ;;  %s131_s22 = int_to_ptr.hbm [resolvable:$true] %s130_s22 }
   0xc   : > { %p866_p8 = pnand %p539_p5, %p119_p7  ;;  %s132_s25 = sshll.u32 %s798_s24, 4  ;;  %s133_s25 = int_to_ptr.vmem [resolvable:$true] %s132_s25 }
   0xd   : > { %s876_s26 = sadd.s32 1, %s796_s15   ;;  %s799_s27 = smov 128  }
   0xe   : > { %p612_p9 = pneg %p866_p8  ;;  %s800_s28 = smov 8  }
   0xf   : > { %s24_s29 = ssub.s32 %s796_s15, %s876_s26  ;;  %s27_s30 = sadd.s32 1, %s792_s14 }
  0x10   : > { %p613_p10 = pnand %p612_p9, %p41_p1  ;;  %p25_p12 = scmp.eq.s32.totalorder %s24_s29, 0 }
  0x11   : > { %p34_p13 = scmp.ne.s32.totalorder %s792_s14, %s788_s13  ;;  %p35_p0 = scmp.eq.s32.totalorder %s796_s15, 0 }
  0x12   : > { %615 = dma.hbm_to_vmem [thread:$0]  (!%p613_p10), %s131_s22, 2048, %s133_s25, [#allocation6], %s799_s27, %s799_s27, %s800_s28  }
  0x13   : > { %s888_s4 = scalar_select %p25_p12, %s792_s14, %s27_s30  }
  0x14   : > { %p892_p3 = por %p106_p2, %p34_p13  ;;  %p625_p5 = scmp.lt.s32.totalorder %s796_s15, 2 }
  0x15   : > { %s149_s6 = sand.u32 1, %s792_s14   ;;  %s554_s7 = sshll.u32 %s796_s15, 8 }
  0x16   : > { %p36_p7 = por %p35_p0, %p34_p13  ;;  %s542_s8 = sshll.u32 %s149_s6, 8 }
  0x17   : > { %s158_s11 = scalar_lea.hbm %s1077_s0, %s554_s7  ;;  %s153_s20 = scalar_lea.vmem [#allocation2], %s542_s8 }
  0x18   : > { %s159_s17 = sshll.u32 %s158_s11, 4  ;;  %s161_s21 = sshll.u32 %s153_s20, 4  ;;  %s160_s17 = int_to_ptr.hbm [resolvable:$true] %s159_s17  ;;  %s162_s21 = int_to_ptr.vmem [resolvable:$true] %s161_s21 }
  0x19   : > { %p902_p9 = pnand %p625_p5, %p36_p7  ;;  %s150_s24 = scalar_lea.sflag [#allocation3], %s149_s6 }
  0x1a   : > { %s696_s25 = sshra.s32 %s160_s17, 4  ;;  %s703_s8 = scalar_lea.hbm %s1077_s0, 512  ;;  %s697_s25 = int_to_ptr.hbm [resolvable:$true] %s696_s25 }
  0x1b   : > { %s698_s29 = scalar_lea.hbm %s697_s25, 256  ;;  %p700_p10 = pneg %p902_p9 }
  0x1c   : > { %p699_p2 = scmp.ne.s32.totalorder %s697_s25, %s698_s29  ;;  %p704_p0 = scmp.lt.s32.totalorder %s697_s25, %s1077_s0 }
  0x1d   : > { %p705_p5 = scmp.lt.s32.totalorder %s703_s8, %s698_s29 }
  0x1e   : > { %p701_p12 = pnand %p700_p10, %p699_p2 }
  0x1f   : > { %p706_p7 = por %p705_p5, %p704_p0 }
  0x20   : > { %p702_p13 = pneg %p701_p12 }
  0x22   : > { %p707_p11 = pnand %p706_p7, %p702_p13 }
  0x24   : > { %710 = shalt.err (!%p707_p11)
}
  0x25   : > { %619 = dma.hbm_to_vmem [thread:$0]  (!%p902_p9), %s160_s17, 4096, %s162_s21, %s150_s24, %s799_s27, %s799_s27, %s800_s28  }
  0x26   : > { %173 = sbr.rel (%p866_p8) target bundleno = 275 (0x113), region = 32  ;;  %s922_s6 = sand.u32 (!%p866_p8), 1, %s788_s13  }
  0x27   : > { %s546_s11 = sshll.u32 (!%p866_p8), %s922_s6, 8  ;;  %s176_s20 = scalar_lea.sflag (!%p866_p8), [#allocation3], %s922_s6 }
  0x28   : > { %s928_s25 = scalar_lea.vmem (!%p866_p8), [#allocation2], %s546_s11 }
  0x2b   : > { %771 = dma.done.wait (%p853_p4), %s176_s20, 4096  }
  0x2c   : > { %773 = vsyncadd (%p853_p4), %s176_s20, 4294963200 }
  0x2d   : > { %775 = dma.done.wait (%p41_p1), [#allocation6], 2048  }
  0x2e   : > { %777 = vsyncadd (%p41_p1), [#allocation6], 4294965248  ;;  %v257_v0 = vld [vmem:[#allocation5 + $0x78] sm:$0xff]  ;;  %v256_v1 = vld [vmem:[#allocation5 + $0x70] sm:$0xff]  ;;  %s979_s27 = scalar_lea.vmem [#allocation7], %s546_s11  ;;  %s555_s28 = sshll.u32 %s844_s16, 8 }
  0x2f   : > { %557 = vmatpush.msra.mxu2 %v257_v0  ;;  %558 = vmatpush.msra.mxu3 %v257_v0  ;;  %v255_v2 = vld [vmem:[#allocation5 + $0x68] sm:$0xff]  ;;  %v254_v3 = vld [vmem:[#allocation5 + $0x60] sm:$0xff]  ;;  %v253_v4 = vld [vmem:[#allocation5 + $0x58] sm:$0xff]  ;;  %s451_s22 = scalar_lea.hbm %s1080_s3, %s555_s28  ;;  %s452_s16 = sshll.u32 %s979_s27, 4  ;;  %s453_s16 = int_to_ptr.vmem [resolvable:$true] %s452_s16 }
  0x30   : > { %262 = vmatpush.msra.mxu0 %v257_v0  ;;  %556 = vmatpush.msra.mxu1 %v257_v0  ;;  %v252_v5 = vld [vmem:[#allocation5 + $0x50] sm:$0xff]  ;;  %v251_v6 = vld [vmem:[#allocation5 + $0x48] sm:$0xff]  ;;  %v250_v7 = vld [vmem:[#allocation5 + $0x40] sm:$0xff]  ;;  %s454_s24 = sshll.u32 %s451_s22, 4  ;;  %s440_s29 = scalar_lea.sflag [#allocation4], %s922_s6  ;;  %s455_s24 = int_to_ptr.hbm [resolvable:$true] %s454_s24 }
  0x31   : > { %560 = vmatpush.msra.mxu2 %v256_v1  ;;  %561 = vmatpush.msra.mxu3 %v256_v1  ;;  %v249_v8 = vld [vmem:[#allocation5 + $0x38] sm:$0xff]  ;;  %v248_v9 = vld [vmem:[#allocation5 + $0x30] sm:$0xff]  ;;  %v247_v10 = vld [vmem:[#allocation5 + $0x28] sm:$0xff]  ;;  %s740_s30 = sshra.s32 %s455_s24, 4  ;;  %s746_s10 = scalar_lea.hbm %s1080_s3, 512  ;;  %s741_s30 = int_to_ptr.hbm [resolvable:$true] %s740_s30 }
  0x32   : > { %263 = vmatpush.msra.mxu0 %v256_v1  ;;  %559 = vmatpush.msra.mxu1 %v256_v1  ;;  %v246_v11 = vld [vmem:[#allocation5 + $0x20] sm:$0xff]  ;;  %v245_v12 = vld [vmem:[#allocation5 + $0x18] sm:$0xff]  ;;  %v244_v13 = vld [vmem:[#allocation5 + $0x10] sm:$0xff]  ;;  %s742_s7 = scalar_lea.hbm %s741_s30, 256  ;;  %p747_p11 = scmp.lt.s32.totalorder %s741_s30, %s1080_s3 }
  0x33   : > { %563 = vmatpush.msra.mxu2 %v255_v2  ;;  %564 = vmatpush.msra.mxu3 %v255_v2  ;;  %v243_v14 = vld [vmem:[#allocation5 + $0x8] sm:$0xff]  ;;  %v242_v15 = vld [vmem:[#allocation5] sm:$0xff]  ;;  %v228_v24 = vld [vmem:[%s928_s25 + $0x90] sm:$0xff]  ;;  %p743_p1 = scmp.ne.s32.totalorder %s741_s30, %s742_s7  ;;  %p748_p9 = scmp.lt.s32.totalorder %s746_s10, %s742_s7 }
  0x34   : > { %264 = vmatpush.msra.mxu0 %v255_v2  ;;  %562 = vmatpush.msra.mxu1 %v255_v2  ;;  %v226_v16 = vld [vmem:[%s928_s25 + $0x80] sm:$0xff]  ;;  %v227_v20 = vld [vmem:[%s928_s25 + $0x88] sm:$0xff]  ;;  %v236_v25 = vld [vmem:[%s928_s25 + $0xd0] sm:$0xff] }
  0x35   : > { %566 = vmatpush.msra.mxu2 %v254_v3  ;;  %567 = vmatpush.msra.mxu3 %v254_v3  ;;  %v234_v17 = vld [vmem:[%s928_s25 + $0xc0] sm:$0xff]  ;;  %v235_v21 = vld [vmem:[%s928_s25 + $0xc8] sm:$0xff]  ;;  %v212_v26 = vld [vmem:[%s928_s25 + $0x10] sm:$0xff]  ;;  %p744_p4 = pnand %p743_p1, %p892_p3  ;;  %p749_p2 = por %p748_p9, %p747_p11 }
  0x36   : > { %265 = vmatpush.msra.mxu0 %v254_v3  ;;  %565 = vmatpush.msra.mxu1 %v254_v3  ;;  %v210_v18 = vld [vmem:[%s928_s25] sm:$0xff]  ;;  %v211_v22 = vld [vmem:[%s928_s25 + $0x8] sm:$0xff]  ;;  %v220_v27 = vld [vmem:[%s928_s25 + $0x50] sm:$0xff] }
  0x37   : > { %569 = vmatpush.msra.mxu2 %v253_v4  ;;  %570 = vmatpush.msra.mxu3 %v253_v4  ;;  %v218_v19 = vld [vmem:[%s928_s25 + $0x40] sm:$0xff]  ;;  %v219_v23 = vld [vmem:[%s928_s25 + $0x48] sm:$0xff]  ;;  %v229_v28 = vld [vmem:[%s928_s25 + $0x98] sm:$0xff]  ;;  %p745_p8 = pneg %p744_p4 }
  0x38   : > { %266 = vmatpush.msra.mxu0 %v253_v4  ;;  %568 = vmatpush.msra.mxu1 %v253_v4  ;;  %v237_v29 = vld [vmem:[%s928_s25 + $0xd8] sm:$0xff]  ;;  %v230_v32 = vld [vmem:[%s928_s25 + $0xa0] sm:$0xff]  ;;  %v231_v36 = vld [vmem:[%s928_s25 + $0xa8] sm:$0xff] }
  0x39   : > { %572 = vmatpush.msra.mxu2 %v252_v5  ;;  %573 = vmatpush.msra.mxu3 %v252_v5  ;;  %v213_v30 = vld [vmem:[%s928_s25 + $0x18] sm:$0xff]  ;;  %v238_v33 = vld [vmem:[%s928_s25 + $0xe0] sm:$0xff]  ;;  %v239_v37 = vld [vmem:[%s928_s25 + $0xe8] sm:$0xff]  ;;  %p750_p10 = pnand %p749_p2, %p745_p8 }
  0x3a   : > { %267 = vmatpush.msra.mxu0 %v252_v5  ;;  %571 = vmatpush.msra.mxu1 %v252_v5  ;;  %v221_v31 = vld [vmem:[%s928_s25 + $0x58] sm:$0xff]  ;;  %v214_v34 = vld [vmem:[%s928_s25 + $0x20] sm:$0xff]  ;;  %v215_v38 = vld [vmem:[%s928_s25 + $0x28] sm:$0xff] }
  0x3b   : > { %575 = vmatpush.msra.mxu2 %v251_v6  ;;  %576 = vmatpush.msra.mxu3 %v251_v6  ;;  %v222_v35 = vld [vmem:[%s928_s25 + $0x60] sm:$0xff]  ;;  %v223_v39 = vld [vmem:[%s928_s25 + $0x68] sm:$0xff]  ;;  %v232_v40 = vld [vmem:[%s928_s25 + $0xb0] sm:$0xff] }
  0x3c   : > { %268 = vmatpush.msra.mxu0 %v251_v6  ;;  %574 = vmatpush.msra.mxu1 %v251_v6  ;;  %v240_v41 = vld [vmem:[%s928_s25 + $0xf0] sm:$0xff]  ;;  %v233_v44 = vld [vmem:[%s928_s25 + $0xb8] sm:$0xff]  ;;  %v973_v48 = vld [vmem:[%s1079_s2] ss:$0 sm:$0xff] }
  0x3d   : > { %578 = vmatpush.msra.mxu2 %v250_v7  ;;  %579 = vmatpush.msra.mxu3 %v250_v7  ;;  %v216_v42 = vld [vmem:[%s928_s25 + $0x30] sm:$0xff]  ;;  %v241_v45 = vld [vmem:[%s928_s25 + $0xf8] sm:$0xff] }
  0x3e   : > { %269 = vmatpush.msra.mxu0 %v250_v7  ;;  %577 = vmatpush.msra.mxu1 %v250_v7  ;;  %v224_v43 = vld [vmem:[%s928_s25 + $0x70] sm:$0xff]  ;;  %v217_v46 = vld [vmem:[%s928_s25 + $0x38] sm:$0xff] }
  0x3f   : > { %581 = vmatpush.msra.mxu2 %v249_v8  ;;  %582 = vmatpush.msra.mxu3 %v249_v8  ;;  %v225_v47 = vld [vmem:[%s928_s25 + $0x78] sm:$0xff] }
  0x40   : > { %270 = vmatpush.msra.mxu0 %v249_v8  ;;  %580 = vmatpush.msra.mxu1 %v249_v8 }
  0x41   : > { %584 = vmatpush.msra.mxu2 %v248_v9  ;;  %585 = vmatpush.msra.mxu3 %v248_v9 }
  0x42   : > { %271 = vmatpush.msra.mxu0 %v248_v9  ;;  %583 = vmatpush.msra.mxu1 %v248_v9 }
  0x43   : > { %587 = vmatpush.msra.mxu2 %v247_v10  ;;  %588 = vmatpush.msra.mxu3 %v247_v10 }
  0x44   : > { %272 = vmatpush.msra.mxu0 %v247_v10  ;;  %586 = vmatpush.msra.mxu1 %v247_v10 }
  0x45   : > { %590 = vmatpush.msra.mxu2 %v246_v11  ;;  %591 = vmatpush.msra.mxu3 %v246_v11 }
  0x46   : > { %273 = vmatpush.msra.mxu0 %v246_v11  ;;  %589 = vmatpush.msra.mxu1 %v246_v11 }
  0x47   : > { %593 = vmatpush.msra.mxu2 %v245_v12  ;;  %594 = vmatpush.msra.mxu3 %v245_v12 }
  0x48   : > { %274 = vmatpush.msra.mxu0 %v245_v12  ;;  %592 = vmatpush.msra.mxu1 %v245_v12 }
  0x49   : > { %596 = vmatpush.msra.mxu2 %v244_v13  ;;  %597 = vmatpush.msra.mxu3 %v244_v13 }
  0x4a   : > { %275 = vmatpush.msra.mxu0 %v244_v13  ;;  %595 = vmatpush.msra.mxu1 %v244_v13 }
  0x4b   : > { %599 = vmatpush.msra.mxu2 %v243_v14  ;;  %600 = vmatpush.msra.mxu3 %v243_v14 }
  0x4c   : > { %276 = vmatpush.msra.mxu0 %v243_v14  ;;  %598 = vmatpush.msra.mxu1 %v243_v14 }
  0x4d   : > { %602 = vmatpush.msra.mxu2 %v242_v15  ;;  %603 = vmatpush.msra.mxu3 %v242_v15 }
  0x4e   : > { %326 = vmatmul.f32.vlgmr.msra.gmra.mxu2 %v226_v16  ;;  %350 = vmatmul.f32.vlgmr.msra.gmra.mxu3 %v234_v17 }
  0x4f   : > { %277 = vmatpush.msra.mxu0 %v242_v15  ;;  %601 = vmatpush.msra.mxu1 %v242_v15 }
  0x50   : > { %278 = vmatmul.f32.vlgmr.msra.gmra.mxu0 %v210_v18  ;;  %302 = vmatmul.f32.vlgmr.msra.gmra.mxu1 %v218_v19 }
  0x56   : > { %329 = vmatmul.f32.gmra.mxu2 %v227_v20  ;;  %353 = vmatmul.f32.gmra.mxu3 %v235_v21 }
  0x58   : > { %281 = vmatmul.f32.gmra.mxu0 %v211_v22  ;;  %305 = vmatmul.f32.gmra.mxu1 %v219_v23 }
  0x5e   : > { %332 = vmatmul.f32.gmra.mxu2 %v228_v24  ;;  %356 = vmatmul.f32.gmra.mxu3 %v236_v25 }
  0x60   : > { %284 = vmatmul.f32.gmra.mxu0 %v212_v26  ;;  %308 = vmatmul.f32.gmra.mxu1 %v220_v27 }
  0x66   : > { %335 = vmatmul.f32.gmra.mxu2 %v229_v28  ;;  %359 = vmatmul.f32.gmra.mxu3 %v237_v29 }
  0x68   : > { %287 = vmatmul.f32.gmra.mxu0 %v213_v30  ;;  %311 = vmatmul.f32.gmra.mxu1 %v221_v31 }
  0x6e   : > { %338 = vmatmul.f32.gmra.mxu2 %v230_v32  ;;  %362 = vmatmul.f32.gmra.mxu3 %v238_v33 }
  0x70   : > { %290 = vmatmul.f32.gmra.mxu0 %v214_v34  ;;  %314 = vmatmul.f32.gmra.mxu1 %v222_v35 }
  0x76   : > { %341 = vmatmul.f32.gmra.mxu2 %v231_v36  ;;  %365 = vmatmul.f32.gmra.mxu3 %v239_v37 }
  0x78   : > { %293 = vmatmul.f32.gmra.mxu0 %v215_v38  ;;  %317 = vmatmul.f32.gmra.mxu1 %v223_v39 }
  0x7e   : > { %344 = vmatmul.f32.gmra.mxu2 %v232_v40  ;;  %368 = vmatmul.f32.gmra.mxu3 %v240_v41 }
  0x80   : > { %296 = vmatmul.f32.gmra.mxu0 %v216_v42  ;;  %320 = vmatmul.f32.gmra.mxu1 %v224_v43 }
  0x86   : > { %347 = vmatmul.f32.gmra.mxu2 %v233_v44  ;;  %371 = vmatmul.f32.gmra.mxu3 %v241_v45 }
  0x88   : > { %299 = vmatmul.f32.gmra.mxu0 %v217_v46  ;;  %323 = vmatmul.f32.gmra.mxu1 %v225_v47 }
  0xcd   : > { %v279_v49 = vpop.f32.mrf.mxu0  ;;  %v303_v50 = vpop.f32.mrf.mxu1 }
  0xce   : > { %v280_v51 = vadd.f32 %v973_v48, %v279_v49  ;;  %v304_v52 = vadd.f32 %v973_v48, %v303_v50 }
  0xd0   : > { %v375_v53 = vmax.f32 %v280_v51, 0.0  ;;  %v383_v54 = vmax.f32 %v304_v52, 0.0 }
  0xd1   : > { %v327_v55 = vpop.f32.mrf.mxu2  ;;  %v351_v56 = vpop.f32.mrf.mxu3 }
  0xd2   : > { %407 = vst [vmem:[%s979_s27] sm:$0xff] %v375_v53  ;;  %v328_v57 = vadd.f32 %v973_v48, %v327_v55  ;;  %v352_v58 = vadd.f32 %v973_v48, %v351_v56 }
  0xd3   : > { %415 = vst [vmem:[%s979_s27 + $0x40] sm:$0xff] %v383_v54 }
  0xd4   : > { %v391_v59 = vmax.f32 %v328_v57, 0.0  ;;  %v399_v60 = vmax.f32 %v352_v58, 0.0 }
  0xd5   : > { %v282_v61 = vpop.f32.mrf.mxu0  ;;  %v306_v62 = vpop.f32.mrf.mxu1 }
  0xd6   : > { %423 = vst [vmem:[%s979_s27 + $0x80] sm:$0xff] %v391_v59  ;;  %v283_v63 = vadd.f32 %v973_v48, %v282_v61  ;;  %v307_v0 = vadd.f32 %v973_v48, %v306_v62 }
  0xd7   : > { %431 = vst [vmem:[%s979_s27 + $0xc0] sm:$0xff] %v399_v60 }
  0xd8   : > { %v376_v1 = vmax.f32 %v283_v63, 0.0  ;;  %v384_v2 = vmax.f32 %v307_v0, 0.0 }
  0xd9   : > { %v330_v3 = vpop.f32.mrf.mxu2  ;;  %v354_v4 = vpop.f32.mrf.mxu3 }
  0xda   : > { %408 = vst [vmem:[%s979_s27 + $0x8] sm:$0xff] %v376_v1  ;;  %v331_v5 = vadd.f32 %v973_v48, %v330_v3  ;;  %v355_v6 = vadd.f32 %v973_v48, %v354_v4 }
  0xdb   : > { %416 = vst [vmem:[%s979_s27 + $0x48] sm:$0xff] %v384_v2 }
  0xdc   : > { %v392_v7 = vmax.f32 %v331_v5, 0.0  ;;  %v400_v8 = vmax.f32 %v355_v6, 0.0 }
  0xdd   : > { %v285_v9 = vpop.f32.mrf.mxu0  ;;  %v309_v10 = vpop.f32.mrf.mxu1 }
  0xde   : > { %424 = vst [vmem:[%s979_s27 + $0x88] sm:$0xff] %v392_v7  ;;  %v286_v11 = vadd.f32 %v973_v48, %v285_v9  ;;  %v310_v12 = vadd.f32 %v973_v48, %v309_v10 }
  0xdf   : > { %432 = vst [vmem:[%s979_s27 + $0xc8] sm:$0xff] %v400_v8 }
  0xe0   : > { %v377_v13 = vmax.f32 %v286_v11, 0.0  ;;  %v385_v14 = vmax.f32 %v310_v12, 0.0 }
  0xe1   : > { %v333_v15 = vpop.f32.mrf.mxu2  ;;  %v357_v16 = vpop.f32.mrf.mxu3 }
  0xe2   : > { %409 = vst [vmem:[%s979_s27 + $0x10] sm:$0xff] %v377_v13  ;;  %v334_v17 = vadd.f32 %v973_v48, %v333_v15  ;;  %v358_v18 = vadd.f32 %v973_v48, %v357_v16 }
  0xe3   : > { %417 = vst [vmem:[%s979_s27 + $0x50] sm:$0xff] %v385_v14 }
  0xe4   : > { %v393_v19 = vmax.f32 %v334_v17, 0.0  ;;  %v401_v20 = vmax.f32 %v358_v18, 0.0 }
  0xe5   : > { %v288_v21 = vpop.f32.mrf.mxu0  ;;  %v312_v22 = vpop.f32.mrf.mxu1 }
  0xe6   : > { %425 = vst [vmem:[%s979_s27 + $0x90] sm:$0xff] %v393_v19  ;;  %v289_v23 = vadd.f32 %v973_v48, %v288_v21  ;;  %v313_v24 = vadd.f32 %v973_v48, %v312_v22 }
  0xe7   : > { %433 = vst [vmem:[%s979_s27 + $0xd0] sm:$0xff] %v401_v20 }
  0xe8   : > { %v378_v25 = vmax.f32 %v289_v23, 0.0  ;;  %v386_v26 = vmax.f32 %v313_v24, 0.0 }
  0xe9   : > { %v336_v27 = vpop.f32.mrf.mxu2  ;;  %v360_v28 = vpop.f32.mrf.mxu3 }
  0xea   : > { %410 = vst [vmem:[%s979_s27 + $0x18] sm:$0xff] %v378_v25  ;;  %v337_v29 = vadd.f32 %v973_v48, %v336_v27  ;;  %v361_v30 = vadd.f32 %v973_v48, %v360_v28 }
  0xeb   : > { %418 = vst [vmem:[%s979_s27 + $0x58] sm:$0xff] %v386_v26 }
  0xec   : > { %v394_v31 = vmax.f32 %v337_v29, 0.0  ;;  %v402_v32 = vmax.f32 %v361_v30, 0.0 }
  0xed   : > { %v291_v33 = vpop.f32.mrf.mxu0  ;;  %v315_v34 = vpop.f32.mrf.mxu1 }
  0xee   : > { %426 = vst [vmem:[%s979_s27 + $0x98] sm:$0xff] %v394_v31  ;;  %v292_v35 = vadd.f32 %v973_v48, %v291_v33  ;;  %v316_v36 = vadd.f32 %v973_v48, %v315_v34 }
  0xef   : > { %434 = vst [vmem:[%s979_s27 + $0xd8] sm:$0xff] %v402_v32 }
  0xf0   : > { %v379_v37 = vmax.f32 %v292_v35, 0.0  ;;  %v387_v38 = vmax.f32 %v316_v36, 0.0 }
  0xf1   : > { %v339_v39 = vpop.f32.mrf.mxu2  ;;  %v363_v40 = vpop.f32.mrf.mxu3 }
  0xf2   : > { %411 = vst [vmem:[%s979_s27 + $0x20] sm:$0xff] %v379_v37  ;;  %v340_v41 = vadd.f32 %v973_v48, %v339_v39  ;;  %v364_v42 = vadd.f32 %v973_v48, %v363_v40 }
  0xf3   : > { %419 = vst [vmem:[%s979_s27 + $0x60] sm:$0xff] %v387_v38 }
  0xf4   : > { %v395_v43 = vmax.f32 %v340_v41, 0.0  ;;  %v403_v44 = vmax.f32 %v364_v42, 0.0 }
  0xf5   : > { %v294_v45 = vpop.f32.mrf.mxu0  ;;  %v318_v46 = vpop.f32.mrf.mxu1 }
  0xf6   : > { %427 = vst [vmem:[%s979_s27 + $0xa0] sm:$0xff] %v395_v43  ;;  %v295_v47 = vadd.f32 %v973_v48, %v294_v45  ;;  %v319_v49 = vadd.f32 %v973_v48, %v318_v46 }
  0xf7   : > { %435 = vst [vmem:[%s979_s27 + $0xe0] sm:$0xff] %v403_v44 }
  0xf8   : > { %v380_v50 = vmax.f32 %v295_v47, 0.0  ;;  %v388_v51 = vmax.f32 %v319_v49, 0.0 }
  0xf9   : > { %v342_v52 = vpop.f32.mrf.mxu2  ;;  %v366_v53 = vpop.f32.mrf.mxu3 }
  0xfa   : > { %412 = vst [vmem:[%s979_s27 + $0x28] sm:$0xff] %v380_v50  ;;  %v343_v54 = vadd.f32 %v973_v48, %v342_v52  ;;  %v367_v55 = vadd.f32 %v973_v48, %v366_v53 }
  0xfb   : > { %420 = vst [vmem:[%s979_s27 + $0x68] sm:$0xff] %v388_v51 }
  0xfc   : > { %v396_v56 = vmax.f32 %v343_v54, 0.0  ;;  %v404_v57 = vmax.f32 %v367_v55, 0.0 }
  0xfd   : > { %v297_v58 = vpop.f32.mrf.mxu0  ;;  %v321_v59 = vpop.f32.mrf.mxu1 }
  0xfe   : > { %428 = vst [vmem:[%s979_s27 + $0xa8] sm:$0xff] %v396_v56  ;;  %v298_v60 = vadd.f32 %v973_v48, %v297_v58  ;;  %v322_v61 = vadd.f32 %v973_v48, %v321_v59 }
  0xff   : > { %436 = vst [vmem:[%s979_s27 + $0xe8] sm:$0xff] %v404_v57 }
 0x100   : > { %v381_v62 = vmax.f32 %v298_v60, 0.0  ;;  %v389_v63 = vmax.f32 %v322_v61, 0.0 }
 0x101   : > { %v345_v0 = vpop.f32.mrf.mxu2  ;;  %v369_v1 = vpop.f32.mrf.mxu3 }
 0x102   : > { %413 = vst [vmem:[%s979_s27 + $0x30] sm:$0xff] %v381_v62  ;;  %v346_v2 = vadd.f32 %v973_v48, %v345_v0  ;;  %v370_v3 = vadd.f32 %v973_v48, %v369_v1 }
 0x103   : > { %421 = vst [vmem:[%s979_s27 + $0x70] sm:$0xff] %v389_v63 }
 0x104   : > { %v397_v4 = vmax.f32 %v346_v2, 0.0  ;;  %v405_v5 = vmax.f32 %v370_v3, 0.0 }
 0x105   : > { %v300_v6 = vpop.f32.mrf.mxu0  ;;  %v324_v7 = vpop.f32.mrf.mxu1 }
 0x106   : > { %429 = vst [vmem:[%s979_s27 + $0xb0] sm:$0xff] %v397_v4  ;;  %v301_v8 = vadd.f32 %v973_v48, %v300_v6  ;;  %v325_v9 = vadd.f32 %v973_v48, %v324_v7 }
 0x107   : > { %437 = vst [vmem:[%s979_s27 + $0xf0] sm:$0xff] %v405_v5 }
 0x108   : > { %v382_v10 = vmax.f32 %v301_v8, 0.0  ;;  %v390_v11 = vmax.f32 %v325_v9, 0.0 }
 0x109   : > { %v348_v12 = vpop.f32.mrf.mxu2  ;;  %v372_v13 = vpop.f32.mrf.mxu3 }
 0x10a   : > { %414 = vst [vmem:[%s979_s27 + $0x38] sm:$0xff] %v382_v10  ;;  %v349_v14 = vadd.f32 %v973_v48, %v348_v12  ;;  %v373_v15 = vadd.f32 %v973_v48, %v372_v13 }
 0x10b   : > { %422 = vst [vmem:[%s979_s27 + $0x78] sm:$0xff] %v390_v11 }
 0x10c   : > { %v398_v16 = vmax.f32 %v349_v14, 0.0  ;;  %v406_v17 = vmax.f32 %v373_v15, 0.0 }
 0x10e   : > { %430 = vst [vmem:[%s979_s27 + $0xb8] sm:$0xff] %v398_v16 }
 0x10f   : > { %438 = vst [vmem:[%s979_s27 + $0xf8] sm:$0xff] %v406_v17 }
 0x110   : > { %753 = shalt.err (!%p750_p10)
}
 0x111   : > { %s801_s6 = smov 128   ;;  %s802_s25 = smov 8  }
 0x112   : > { %610 = dma.vmem_to_hbm [thread:$0]  (%p892_p3), %s453_s16, 4096, %s455_s24, %s440_s29, %s801_s6, %s801_s6, %s802_s25  }
 0x113 PF: > { %s469_s18 = sand.u32 1, %s784_s12   ;;  %p1086_p12 = scmp.ge.s32.totalorder %s796_s15, 2 }
 0x114   : > { %s470_s23 = scalar_lea.sflag [#allocation4], %s469_s18 }
 0x115   : > { %p621_p13 = pnand %p1086_p12, %p858_p6 }
 0x117   : > { %p622_p0 = pneg %p621_p13 }
 0x119   : > { %779 = dma.done.wait (%p622_p0), %s470_s23, 4096  }
 0x11a   : > { %781 = vsyncadd (%p622_p0), %s470_s23, 4294963200  ;;  %p17_p5 = scmp.ge.s32.totalorder %s876_s26, 4   ;;  %s1087_s12 = smov %s788_s13 }
 0x11b   : > { %s1088_s13 = smov %s792_s14  ;;  %s1089_s14 = smov %s888_s4 }
 0x11c   : > { %s1090_s15 = smov %s876_s26  ;;  %19 = sbr.rel (!%p17_p5) target bundleno = 6 (0x6), region = 81 }
 0x121   :  { %476 = vsyncpa [#allocation3], 1 }
 0x122   :  { %478 = vsyncpa [#allocation3 + $0x1], 1 }
 0x123   :  { %479 = vsyncpa [#allocation6], 1 }
 0x124   :  { %480 = vsyncpa [#allocation4], 1 }
 0x125   :  { %482 = vsyncpa [#allocation4 + $0x1], 1 }

</bundles_post_ra>
